<compile_context>
chip_gen: v6e
topology: v6e:2x2x1
jax: 0.10.0
libtpu: 0.0.40
codegen_flags: <defaults>
</compile_context>

<pallas_src>
import functools

import jax
import jax.numpy as jnp
from jax.experimental import pallas as pl
from jax.experimental.pallas import tpu as pltpu

EPS = 1e-10


# ---------------------------------------------------------------------------
# Kernel
# ---------------------------------------------------------------------------
def _bilinear_attn_kernel(has_mask, eps, *refs):
    """Grid = (batch blocks, D chunks); the D (reduction) axis is innermost.

    Per-step ref layouts:
      hid_ref  : [tb, td]          hid_fea chunk (= (hidden @ W.T)[:, d-chunk])
      enc_ref  : [S, tb, td]       native [S, B, D] layout, D on the 128-lane axis
      mask_ref : [tb, S] float32   1.0 = padded (only if has_mask)
      out_ref  : [tb, S] float32
      acc_ref  : [S, tb] float32   partial-score accumulator (VMEM scratch)
    """
    if has_mask:
        hid_ref, enc_ref, mask_ref, out_ref, acc_ref = refs
    else:
        hid_ref, enc_ref, out_ref, acc_ref = refs

    d = pl.program_id(1)
    nd = pl.num_programs(1)

    @pl.when(d == 0)
    def _init():
        acc_ref[...] = jnp.zeros_like(acc_ref)

    # Partial scores for this D chunk:
    #   acc[s, b] += sum_d enc[s, b, d] * hid_fea[b, d]
    # The product stays in enc's dtype (no full-tile f32 upcast of the big operand);
    # the reduction accumulates in f32.  td is bounded by the wrapper's block chooser,
    # so this temporary never approaches full-D size (chunked-D accumulation).
    enc = enc_ref[...]                                    # [S, tb, td]
    hid = hid_ref[...].astype(enc.dtype)                  # [tb, td]
    acc_ref[...] += jnp.sum(enc * hid[None, :, :], axis=-1, dtype=jnp.float32)

    @pl.when(d == nd - 1)
    def _finalize():
        # Small [S, tb] -> [tb, S] transpose so the softmax reductions and the
        # output store run along the lane axis (S).
        scores = jnp.transpose(acc_ref[...])              # [tb, S] f32
        m = jnp.max(scores, axis=-1, keepdims=True)
        e = jnp.exp(scores - m)
        z = jnp.sum(e, axis=-1, keepdims=True)
        attn = e / z                                      # softmax over S (exact divide)
        if has_mask:
            attn = attn * (1.0 - mask_ref[...])           # masked_fill(mask, 0)
            renorm = jnp.sum(attn, axis=-1, keepdims=True)
            attn = attn / (renorm + eps)                  # renormalize (+eps), as in PyTorch
        out_ref[...] = attn.astype(out_ref.dtype)


# ---------------------------------------------------------------------------
# Block / VMEM sizing
# ---------------------------------------------------------------------------
def _vmem_capacity_bytes():
    try:
        cap = int(pltpu.get_tpu_info().vmem_capacity_bytes)
        if cap >= 32 * 1024 * 1024:
            return cap
    except Exception:
        pass
    return 64 * 1024 * 1024  # conservative default (v7x per-core VMEM)


def _largest_d_chunk(D, limit):
    """Largest multiple-of-128 divisor of D that is <= limit (falls back to full D)."""
    best = None
    for c in range(128, min(D, limit) + 1, 128):
        if D % c == 0:
            best = c
    return best if best is not None else D


def _choose_blocks(B, S, D, itemsize, block_budget):
    # Lane (D) chunk: cap at 512 so the per-step f32 partial-product temporary
    # stays bounded even before batch tiling kicks in.
    td = D if D <= 512 else _largest_d_chunk(D, 512)

    # Batch block: a multiple of 8 (sublane rule) or the full batch.  Cap it so the
    # "parallel" batch grid axis keeps >= 2 steps when B allows (pipelining + v7x
    # megacore); B <= 8 cannot be split.
    tb_cap = B if B <= 8 else max(8, ((B // 4) // 8) * 8)

    def fit_tb(td_):
        t = block_budget // max(1, S * td_ * itemsize)
        t = min(t, tb_cap, B)
        if t >= B:
            return B
        return (t // 8) * 8  # 0 -> even an 8-row slab does not fit

    tb = fit_tb(td)
    if tb == 0:
        # A minimal batch slab at this D chunk exceeds the budget: shrink the D chunk
        # instead of silently rounding the batch block up (the old sizing bug).
        tb = min(8, B)
        max_td = block_budget // max(1, S * tb * itemsize)
        td = _largest_d_chunk(D, max(128, (max_td // 128) * 128))
        # If D has no small multiple-of-128 divisor this may still exceed the soft
        # budget; the raised vmem_limit below leaves headroom for that rare case.
    return tb, td


# ---------------------------------------------------------------------------
# Wrapper
# ---------------------------------------------------------------------------
def bilinear_attention(enc_outputs, enc_padding_mask, hidden, proj_weight,
                       eps=EPS, block_b=None, block_d=None):
    """Forward of the PyTorch `bilinear_attention` module.

    enc_outputs      : [S, B, D]
    enc_padding_mask : [S, B] bool (True = padded) or None
    hidden           : [B, H]
    proj_weight      : [D, H]   (nn.Linear(hid_size, input_size, bias=False).weight)
    returns attn_dist: [S, B] float32
    """
    S, B, D = enc_outputs.shape
    Bh, H = hidden.shape
    assert Bh == B and proj_weight.shape == (D, H)
    has_mask = enc_padding_mask is not None
    if has_mask:
        assert enc_padding_mask.shape == (S, B)

    itemsize = jnp.dtype(enc_outputs.dtype).itemsize
    vmem_cap = _vmem_capacity_bytes()
    vmem_limit = (vmem_cap * 3) // 4            # ~48 MiB on v7x, ~96 MiB on v5e/v6e
    block_budget = vmem_limit // 5              # double-buffered enc block + f32 temp headroom

    tb, td = _choose_blocks(B, S, D, itemsize, block_budget)
    if block_b is not None:
        tb = block_b
    if block_d is not None:
        td = block_d
    assert tb == B or tb % 8 == 0, "batch block must be a multiple of 8 or the full batch"
    assert td == D or (td % 128 == 0 and D % td == 0), \
        "D block must be a multiple of 128 that divides D (or the full D)"

    grid = (pl.cdiv(B, tb), pl.cdiv(D, td))     # D (reduction) axis innermost

    # Tiny wrapper-side work only; the big enc tensor is consumed as-is.
    hid_fea = hidden @ proj_weight.T            # [B, D] projection (per perf review)

    in_specs = [
        pl.BlockSpec((tb, td), lambda b, d: (b, d)),          # hid_fea [B, D]
        pl.BlockSpec((S, tb, td), lambda b, d: (0, b, d)),    # enc     [S, B, D] native
    ]
    args = [hid_fea, enc_outputs]
    if has_mask:
        mask_bt = jnp.transpose(enc_padding_mask, (1, 0)).astype(jnp.float32)  # [B, S]
        in_specs.append(pl.BlockSpec((tb, S), lambda b, d: (b, 0)))
        args.append(mask_bt)

    out_specs = pl.BlockSpec((tb, S), lambda b, d: (b, 0))

    flops = 2 * S * B * D + 6 * S * B
    bytes_accessed = (S * B * D * itemsize          # enc
                      + B * D * hid_fea.dtype.itemsize
                      + B * S * 4                   # output
                      + (B * S * 4 if has_mask else 0))

    out_bt = pl.pallas_call(
        functools.partial(_bilinear_attn_kernel, has_mask, float(eps)),
        out_shape=jax.ShapeDtypeStruct((B, S), jnp.float32),
        grid_spec=pltpu.PrefetchScalarGridSpec(
            num_scalar_prefetch=0,
            grid=grid,
            in_specs=in_specs,
            out_specs=out_specs,
            scratch_shapes=[pltpu.VMEM((S, tb), jnp.float32)],   # score accumulator
        ),
        compiler_params=pltpu.CompilerParams(
            dimension_semantics=("parallel", "arbitrary"),
            vmem_limit_bytes=int(vmem_limit),
        ),
        cost_estimate=pl.CostEstimate(
            flops=flops, transcendentals=S * B, bytes_accessed=bytes_accessed),
    )(*args)

    # Cheap [B, S] -> [S, B] transpose of the small attention output.
    return jnp.transpose(out_bt, (1, 0))


# ---------------------------------------------------------------------------
# Pure-JAX reference (mirrors the PyTorch forward op-for-op)
# ---------------------------------------------------------------------------
def _reference(enc_outputs, enc_padding_mask, hidden, proj_weight, eps=EPS):
    hid_fea = (hidden @ proj_weight.T)[None, :, :]          # [1, B, D]
    scores = jnp.sum(hid_fea * enc_outputs, axis=-1)        # [S, B]
    attn = jax.nn.softmax(scores, axis=0)
    if enc_padding_mask is not None:
        attn = jnp.where(enc_padding_mask, 0.0, attn)
        attn = attn / (jnp.sum(attn, axis=0, keepdims=True) + eps)
    return attn


if __name__ == "__main__":
    S, B, D, H = 24, 16, 256, 32   # seq_len, batch, input_size, hid_size
    key = jax.random.PRNGKey(0)
    k1, k2, k3 = jax.random.split(key, 3)

    enc_outputs = jax.random.normal(k1, (S, B, D), dtype=jnp.float32)
    hidden = jax.random.normal(k2, (B, H), dtype=jnp.float32)
    # deterministic nn.Linear(hid_size, input_size, bias=False) weight: [D, H]
    proj_weight = (jax.random.uniform(k3, (D, H), dtype=jnp.float32) - 0.5) * (
        2.0 / jnp.sqrt(H))

    # padding mask: a few trailing positions of a few batch elements are padded
    enc_padding_mask = (
        jnp.zeros((S, B), dtype=jnp.bool_)
        .at[S - 5:, 1].set(True)
        .at[S - 9:, 7].set(True)
        .at[S - 2:, 12].set(True)
    )

    ref_m = _reference(enc_outputs, enc_padding_mask, hidden, proj_weight)
    ref_nm = _reference(enc_outputs, None, hidden, proj_weight)

    # 1) masked path, auto-chosen blocks (batch grid gets 2 steps at these shapes)
    out_m = jax.block_until_ready(
        bilinear_attention(enc_outputs, enc_padding_mask, hidden, proj_weight))
    assert out_m.shape == (S, B) and out_m.dtype == jnp.float32
    assert jnp.allclose(out_m, ref_m, atol=2e-5, rtol=2e-4), "mismatch vs reference (masked)"

    # 2) masked path with forced batch + D chunking (exercises the accumulation axis)
    out_m2 = jax.block_until_ready(
        bilinear_attention(enc_outputs, enc_padding_mask, hidden, proj_weight,
                           block_b=8, block_d=128))
    assert jnp.allclose(out_m2, ref_m, atol=2e-5, rtol=2e-4), \
        "mismatch vs reference (masked, chunked D)"

    # 3) mask-free path (matches PyTorch exactly: plain softmax, no renorm)
    out_nm = jax.block_until_ready(
        bilinear_attention(enc_outputs, None, hidden, proj_weight))
    assert jnp.allclose(out_nm, ref_nm, atol=2e-5, rtol=2e-4), "mismatch vs reference (no mask)"

    print("KERNEL_OK")
</pallas_src>

<mosaic_0001>
module attributes {stable_mosaic.version = 11 : i64} {
  func.func @_bilinear_attn_kernel(%arg0: i32, %arg1: i32, %arg2: memref<8x256xf32, #tpu.memory_space<vmem>>, %arg3: memref<24x8x256xf32, #tpu.memory_space<vmem>>, %arg4: memref<8x24xf32, #tpu.memory_space<vmem>>, %arg5: memref<8x24xf32, #tpu.memory_space<vmem>>, %arg6: memref<24x8xf32, #tpu.memory_space<vmem>>) attributes {dimension_semantics = [#tpu.dimension_semantics<parallel>, #tpu.dimension_semantics<arbitrary>], iteration_bounds = array<i64: 2, 1>, scalar_prefetch = 0 : i64, scratch_operands = 1 : i64, tpu.core_type = #tpu.core_type<tc>, window_params = [{transform_indices = @transform_0, window_bounds = array<i64: 8, 256>}, {transform_indices = @transform_1, window_bounds = array<i64: 24, 8, 256>}, {transform_indices = @transform_2, window_bounds = array<i64: 8, 24>}, {transform_indices = @transform_3, window_bounds = array<i64: 8, 24>}]} {
    %c0_i32 = arith.constant 0 : i32
    %0 = arith.cmpi eq, %arg1, %c0_i32 : i32
    %1 = arith.extui %0 : i1 to i32
    %c0_i32_0 = arith.constant 0 : i32
    %2 = arith.cmpi ne, %1, %c0_i32_0 : i32
    scf.if %2 {
      %cst_11 = arith.constant 0.000000e+00 : f32
      %15 = vector.broadcast %cst_11 : f32 to vector<24x8xf32>
      %c0_12 = arith.constant 0 : index
      %c0_13 = arith.constant 0 : index
      %16 = vector.load %arg6[%c0_12, %c0_13] : memref<24x8xf32, #tpu.memory_space<vmem>>, vector<24x8xf32>
      tpu.vector_store %arg6[%c0_12, %c0_13], %15 {strides = array<i32>} : memref<24x8xf32, #tpu.memory_space<vmem>>, vector<24x8xf32>,
    } else {
    }
    %c0 = arith.constant 0 : index
    %c0_1 = arith.constant 0 : index
    %c0_2 = arith.constant 0 : index
    %3 = vector.load %arg3[%c0, %c0_1, %c0_2] : memref<24x8x256xf32, #tpu.memory_space<vmem>>, vector<24x8x256xf32>
    %c0_3 = arith.constant 0 : index
    %c0_4 = arith.constant 0 : index
    %4 = vector.load %arg2[%c0_3, %c0_4] : memref<8x256xf32, #tpu.memory_space<vmem>>, vector<8x256xf32>
    %c0_5 = arith.constant 0 : index
    %c0_6 = arith.constant 0 : index
    %5 = vector.load %arg6[%c0_5, %c0_6] : memref<24x8xf32, #tpu.memory_space<vmem>>, vector<24x8xf32>
    %6 = vector.shape_cast %4 : vector<8x256xf32> to vector<1x8x256xf32>
    %7 = vector.broadcast %6 : vector<1x8x256xf32> to vector<24x8x256xf32>
    %8 = arith.mulf %3, %7 : vector<24x8x256xf32>
    %cst = arith.constant dense<0.000000e+00> : vector<24x8xf32>
    %9 = vector.multi_reduction <add>, %8, %cst [2] : vector<24x8x256xf32> to vector<24x8xf32>
    %10 = arith.addf %5, %9 : vector<24x8xf32>
    %c0_7 = arith.constant 0 : index
    %c0_8 = arith.constant 0 : index
    %11 = vector.load %arg6[%c0_7, %c0_8] : memref<24x8xf32, #tpu.memory_space<vmem>>, vector<24x8xf32>
    tpu.vector_store %arg6[%c0_7, %c0_8], %10 {strides = array<i32>} : memref<24x8xf32, #tpu.memory_space<vmem>>, vector<24x8xf32>,
    %c0_i32_9 = arith.constant 0 : i32
    %12 = arith.cmpi eq, %arg1, %c0_i32_9 : i32
    %13 = arith.extui %12 : i1 to i32
    %c0_i32_10 = arith.constant 0 : i32
    %14 = arith.cmpi ne, %13, %c0_i32_10 : i32
    scf.if %14 {
      %c0_11 = arith.constant 0 : index
      %c0_12 = arith.constant 0 : index
      %15 = vector.load %arg6[%c0_11, %c0_12] : memref<24x8xf32, #tpu.memory_space<vmem>>, vector<24x8xf32>
      %16 = tpu.transpose %15, [1, 0] : vector<24x8xf32> -> vector<8x24xf32>
      %cst_13 = arith.constant dense<0xFF800000> : vector<8xf32>
      %17 = vector.multi_reduction <maximumf>, %16, %cst_13 [1] : vector<8x24xf32> to vector<8xf32>
      %18 = vector.shape_cast %17 : vector<8xf32> to vector<8x1xf32>
      %19 = vector.broadcast %18 : vector<8x1xf32> to vector<8x24xf32>
      %20 = arith.subf %16, %19 : vector<8x24xf32>
      %21 = math.exp %20 : vector<8x24xf32>
      %cst_14 = arith.constant dense<0.000000e+00> : vector<8xf32>
      %22 = vector.multi_reduction <add>, %21, %cst_14 [1] : vector<8x24xf32> to vector<8xf32>
      %23 = vector.shape_cast %22 : vector<8xf32> to vector<8x1xf32>
      %24 = vector.broadcast %23 : vector<8x1xf32> to vector<8x24xf32>
      %25 = arith.divf %21, %24 : vector<8x24xf32>
      %c0_15 = arith.constant 0 : index
      %c0_16 = arith.constant 0 : index
      %26 = vector.load %arg4[%c0_15, %c0_16] : memref<8x24xf32, #tpu.memory_space<vmem>>, vector<8x24xf32>
      %cst_17 = arith.constant 1.000000e+00 : f32
      %27 = vector.broadcast %cst_17 : f32 to vector<8x24xf32>
      %28 = arith.subf %27, %26 : vector<8x24xf32>
      %29 = arith.mulf %25, %28 : vector<8x24xf32>
      %cst_18 = arith.constant dense<0.000000e+00> : vector<8xf32>
      %30 = vector.multi_reduction <add>, %29, %cst_18 [1] : vector<8x24xf32> to vector<8xf32>
      %31 = vector.shape_cast %30 : vector<8xf32> to vector<8x1xf32>
      %cst_19 = arith.constant 1.000000e-10 : f32
      %32 = vector.broadcast %cst_19 : f32 to vector<8x1xf32>
      %33 = arith.addf %31, %32 : vector<8x1xf32>
      %34 = vector.broadcast %33 : vector<8x1xf32> to vector<8x24xf32>
      %35 = arith.divf %29, %34 : vector<8x24xf32>
      %c0_20 = arith.constant 0 : index
      %c0_21 = arith.constant 0 : index
      %36 = vector.load %arg5[%c0_20, %c0_21] : memref<8x24xf32, #tpu.memory_space<vmem>>, vector<8x24xf32>
      tpu.vector_store %arg5[%c0_20, %c0_21], %35 {strides = array<i32>} : memref<8x24xf32, #tpu.memory_space<vmem>>, vector<8x24xf32>,
    } else {
    }
    return
  }
  func.func @transform_0(%arg0: i32, %arg1: i32) -> (i32, i32) {
    %c0_i32 = arith.constant 0 : i32
    return %arg0, %arg1 : i32, i32
  }
  func.func @transform_1(%arg0: i32, %arg1: i32) -> (i32, i32, i32) {
    %c0_i32 = arith.constant 0 : i32
    %c0_i32_0 = arith.constant 0 : i32
    return %c0_i32, %arg0, %arg1 : i32, i32, i32
  }
  func.func @transform_2(%arg0: i32, %arg1: i32) -> (i32, i32) {
    %c0_i32 = arith.constant 0 : i32
    %c0_i32_0 = arith.constant 0 : i32
    return %arg0, %c0_i32 : i32, i32
  }
  func.func @transform_3(%arg0: i32, %arg1: i32) -> (i32, i32) {
    %c0_i32 = arith.constant 0 : i32
    %c0_i32_0 = arith.constant 0 : i32
    return %arg0, %c0_i32 : i32, i32
  }
}

</mosaic_0001>

<bundles_post_ra>
// kernel: tpu_custom_call.1
= control target key start
LH: loop header
LB: loop body
LE: loop exit
PB: predicated region body
PF: predicated region fallthrough
CT: control target
= control target key end

     0   :  { %s1471_s0 = inlined_call_operand.hbm [shape: f32[16,256], index: 0, kind: input, shape index: {}]   ;;  %s1472_s1 = inlined_call_operand.hbm [shape: f32[24,16,256], index: 1, kind: input, shape index: {}]   ;;  %s1473_s2 = inlined_call_operand.hbm [shape: f32[16,24], index: 2, kind: input, shape index: {}]   ;;  %s1474_s3 = inlined_call_operand.hbm [shape: f32[16,24], index: 3, kind: output, shape index: {}]  }
   0x1   :  { %1477 = sst [smem:[#allocation16_spill]] %s1472_s1 }
   0x2   :  { %8 = vsyncpa [#allocation4], 0 }
   0x3   :  { %10 = vsyncpa [#allocation4 + $0x1], 0 }
   0x4   :  { %11 = vsyncpa [#allocation7], 0 }
   0x5   :  { %13 = vsyncpa [#allocation7 + $0x1], 0 }
   0x6   :  { %14 = vsyncpa [#allocation5], 0 }
   0x7   :  { %16 = vsyncpa [#allocation5 + $0x1], 0  ;;  %s1128_s12 = smov 0   ;;  %s1130_s13 = smov 0  }
   0x8   :  { %s1132_s14 = smov 0   ;;  %s1134_s15 = smov 0  }
   0x9   :  { %s1136_s16 = smov 0   ;;  %s1138_s17 = smov 0  }
   0xa LB: > { %1478 = sst [smem:[#allocation13_spill]] %s1086_s14  ;;  %s1159_s18 = sadd.s32 4294967295, %s1098_s17   ;;  %s1098_s17 = sphi %s1138_s17, %s22_s17   ;;  %s1094_s16 = sphi %s1136_s16, %s1495_s16   ;;  %s1090_s15 = sphi %s1134_s15, %s1494_s15   ;;  %s1086_s14 = sphi %s1132_s14, %s1490_s14   ;;  %s1082_s13 = sphi %s1130_s13, %s1493_s13   ;;  %s1078_s12 = sphi %s1128_s12, %s1492_s12  }
   0xb   : > { %s826_s19 = sadd.s32 4294967294, %s1098_s17   ;;  %s34_s20 = sadd.s32 1, %s1094_s16 }
   0xc   : > { %s43_s21 = sadd.s32 1, %s1086_s14  ;;  %p36_p0 = scmp.ge.s32.totalorder %s34_s20, 2 }
   0xd   : > { %p50_p1 = scmp.ne.s32.totalorder %s1086_s14, %s1082_s13  ;;  %p51_p2 = scmp.eq.s32.totalorder %s1098_s17, 0 }
   0xe   : > { %p56_p3 = scmp.ne.s32.totalorder %s1082_s13, %s1078_s12  ;;  %s1497_s20 = smov (%p36_p0, %s34_s20), 0 }
   0xf   : > { %1479 = sst [smem:[#allocation14_spill]] %s1497_s20  ;;  %p1171_p4 = por %p51_p2, %p50_p1 }
  0x10   : > { %p57_p5 = scmp.eq.s32.totalorder %s1159_s18, 0  ;;  %s38_s23 = ssub.s32 %s1094_s16, %s1497_s20 }
  0x11   : > { %p134_p6 = scmp.eq.s32.totalorder %s1159_s18, 1  ;;  %p41_p7 = scmp.eq.s32.totalorder %s38_s23, 0 }
  0x12   : > { %p1179_p8 = por %p57_p5, %p56_p3  ;;  %p140_p10 = scmp.eq.s32.totalorder %s826_s19, 1 }
  0x13   : > { %p1183_p9 = por %p134_p6, %p50_p1  ;;  %p870_p13 = scmp.lt.s32.totalorder %s1098_s17, 2 }
  0x14   : > { %s1188_s26 = scalar_select %p41_p7, %s1086_s14, %s43_s21  }
  0x15   : > { %p1190_p11 = por %p140_p10, %p56_p3  ;;  %s1197_s28 = sand.u32 1, %s1086_s14  }
  0x16   : > { %1483 = sst [smem:[#allocation15_spill]] %s1188_s26  ;;  %s844_s29 = sshll.u32 %s1094_s16, 8 }
  0x17   : > { %s181_s30 = sand.u32 1, %s1098_s17   ;;  %p1203_p0 = pnand %p870_p13, %p1171_p4 }
  0x18   : > { %s846_s5 = smul.u32 384, %s1197_s28  ;;  %s1486_s1 = sld [smem:[#allocation16_spill]] }
  0x19   : > { %p836_p1 = scmp.ge.s32.totalorder %s1098_s17, 1  ;;  %s1214_s11 = scalar_lea.sflag [#allocation7], %s181_s30 }
  0x1a   : > { %s185_s9 = scalar_lea.vmem [#allocation6], %s846_s5  ;;  %p932_p2 = pneg %p1203_p0 }
  0x1b   : > { %s194_s10 = sshll.u32 %s185_s9, 4  ;;  %s1100_s21 = smov [#allocation6]   ;;  %s195_s10 = int_to_ptr.vmem [resolvable:$true] %s194_s10 }
  0x1c   : > { %s943_s19 = scalar_lea.vmem %s195_s10, 6144  ;;  %s948_s22 = sshll.u32 %s1100_s21, 4  ;;  %s949_s22 = int_to_ptr.vmem [resolvable:$false] %s948_s22 }
  0x1d   : > { %p944_p3 = scmp.ne.s32.totalorder %s195_s10, %s943_s19  ;;  %s950_s23 = scalar_lea.vmem %s949_s22, 12288 }
  0x1e   : > { %s193_s8 = scalar_lea.hbm %s1486_s1, %s844_s29  ;;  %p951_p6 = scmp.lt.s32.totalorder %s195_s10, %s949_s22 }
  0x1f   : > { %p946_p4 = pnand %p944_p3, %p932_p2  ;;  %p952_p7 = scmp.lt.s32.totalorder %s950_s23, %s943_s19 }
  0x21   : > { %p947_p5 = pneg %p946_p4  ;;  %p953_p10 = por %p952_p7, %p951_p6 }
  0x23   : > { %p954_p13 = pnand %p953_p10, %p947_p5 }
  0x25   : > { %957 = shalt.err (!%p954_p13)
}
  0x26   : > { %s1101_s5 = smov 512   ;;  %s1102_s30 = smov 256  }
  0x27   : > { %s1103_s6 = smov 16   ;;  %p220_p3 = scmp.lt.s32.totalorder %s1098_s17, 3 }
  0x28   : > { %862 = dma.hbm_to_vmem [thread:$0]  (!%p1203_p0), %s193_s8, 6144, %s195_s10, %s1214_s11, %s1101_s5, %s1102_s30, %s1103_s6  }
  0x29   : > { %p1227_p4 = pnand %p836_p1, %p220_p3  ;;  %s829_s9 = sshll.u32 %s1197_s28, 4 }
  0x2a   : > { %s172_s22 = scalar_lea.hbm %s1471_s0, %s844_s29  ;;  %s164_s23 = scalar_lea.vmem [#allocation3], %s829_s9 }
  0x2b   : > { %s174_s1 = sshll.u32 %s164_s23, 4  ;;  %s834_s20 = sshll.u32 %s1197_s28, 3  ;;  %s175_s1 = int_to_ptr.vmem [resolvable:$true] %s174_s1 }
  0x2c   : > { %s161_s26 = scalar_lea.sflag [#allocation4], %s1197_s28  ;;  %s971_s14 = scalar_lea.vmem %s175_s1, 256 }
  0x2d   : > { %p972_p5 = scmp.ne.s32.totalorder %s175_s1, %s971_s14  ;;  %s1104_s8 = smov [#allocation3]  }
  0x2e   : > { %s976_s10 = sshll.u32 %s1104_s8, 4  ;;  %s977_s10 = int_to_ptr.vmem [resolvable:$false] %s976_s10 }
  0x2f   : > { %p974_p6 = pnand %p972_p5, %p932_p2  ;;  %s978_s5 = scalar_lea.vmem %s977_s10, 512 }
  0x30   : > { %p979_p7 = scmp.lt.s32.totalorder %s175_s1, %s977_s10  ;;  %p980_p10 = scmp.lt.s32.totalorder %s978_s5, %s971_s14 }
  0x31   : > { %p975_p1 = pneg %p974_p6 }
  0x32   : > { %p981_p13 = por %p980_p10, %p979_p7 }
  0x34   : > { %p982_p3 = pnand %p981_p13, %p975_p1 }
  0x36   : > { %985 = shalt.err (!%p982_p3)
}
  0x37   : > { %859 = dma.hbm_to_vmem [thread:$0]  (!%p1203_p0), %s172_s22, 256, %s175_s1, %s161_s26  }
  0x38   : > { %s835_s28 = sshll.u32 %s1094_s16, 7  ;;  %s208_s29 = scalar_lea.vmem [#allocation8], %s834_s20 }
  0x39   : > { %s215_s30 = sshll.u32 %s208_s29, 4  ;;  %s213_s19 = scalar_lea.hbm %s1473_s2, %s835_s28  ;;  %s216_s30 = int_to_ptr.vmem [resolvable:$true] %s215_s30 }
  0x3a   : > { %s999_s21 = scalar_lea.vmem %s216_s30, 128  ;;  %s1105_s14 = smov [#allocation8]  }
  0x3b   : > { %p1000_p5 = scmp.ne.s32.totalorder %s216_s30, %s999_s21  ;;  %s1004_s23 = sshll.u32 %s1105_s14, 4  ;;  %s1005_s23 = int_to_ptr.vmem [resolvable:$false] %s1004_s23 }
  0x3c   : > { %s1006_s8 = scalar_lea.vmem %s1005_s23, 256  ;;  %p1007_p7 = scmp.lt.s32.totalorder %s216_s30, %s1005_s23 }
  0x3d   : > { %p1002_p6 = pnand %p1000_p5, %p932_p2  ;;  %p1008_p10 = scmp.lt.s32.totalorder %s1006_s8, %s999_s21 }
  0x3f   : > { %p1003_p1 = pneg %p1002_p6  ;;  %p1009_p13 = por %p1008_p10, %p1007_p7 }
  0x41   : > { %p1010_p3 = pnand %p1009_p13, %p1003_p1 }
  0x43   : > { %1013 = shalt.err (!%p1010_p3)
}
  0x44   : > { %865 = dma.hbm_to_vmem [thread:$0]  (!%p1203_p0), %s213_s19, 128, %s216_s30, %s1214_s11  }
  0x45   : > { %224 = sbr.rel (%p1227_p4) target bundleno = 883 (0x373), region = 32  ;;  %s1257_s1 = sand.u32 (!%p1227_p4), 1, %s1082_s13  }
  0x46   : > { %s837_s20 = sshll.u32 (!%p1227_p4), %s1257_s1, 4  ;;  %s227_s26 = scalar_lea.sflag (!%p1227_p4), [#allocation4], %s1257_s1 }
  0x47   : > { %s230_s22 = scalar_lea.vmem (!%p1227_p4), [#allocation3], %s837_s20 }
  0x4a   : > { %1065 = dma.done.wait (%p1179_p8), %s227_s26, 256  }
  0x4b   : > { %1067 = vsyncadd (%p1179_p8), %s227_s26, 4294967040  ;;  %s235_s4 = sand.u32 1, %s1159_s18   ;;  %s847_s11 = smul.u32 384, %s1257_s1 }
  0x4c   : > { %s236_s7 = scalar_lea.sflag [#allocation7], %s235_s4 }
  0x4d   : > { %s1267_s10 = scalar_lea.vmem [#allocation6], %s847_s11 }
  0x4e   : > { %1069 = dma.done.wait (%p1179_p8), %s236_s7, 6272  }
  0x4f   : > { %1071 = vsyncadd (%p1179_p8), %s236_s7, 4294961024  ;;  %v295_v0 = vld [vmem:[%s1267_s10 + $0x20] sm:$0xff]  ;;  %v296_v1 = vld [vmem:[%s1267_s10 + $0x28] sm:$0xff]  ;;  %vm287_vm0 = vcmask 64512   ;;  %vm586_vm1 = vcmask 1041409   ;;  %vm588_vm2 = vcmask 1042434  }
  0x50   : > { %v1275_v2 = vld [vmem:[%s230_s22] sm:$0xff]  ;;  %v1277_v3 = vld [vmem:[%s230_s22 + $0x8] sm:$0xff]  ;;  %vm590_vm3 = vcmask 1043459   ;;  %vm592_vm4 = vcmask 1044484   ;;  %vm594_vm5 = vcmask 1045509   ;;  %vm596_vm6 = vcmask 1046534  }
  0x51   : > { %v348_v4 = vmul.f32 %v1275_v2, %v295_v0  ;;  %v291_v5 = vld [vmem:[%s1267_s10] sm:$0xff]  ;;  %v292_v6 = vld [vmem:[%s1267_s10 + $0x8] sm:$0xff]  ;;  %v349_v7 = vmul.f32 %v1277_v3, %v296_v1  ;;  %v297_v10 = vld [vmem:[%s1267_s10 + $0x30] sm:$0xff]  ;;  %vm598_vm7 = vcmask 1047559   ;;  %vm662_vm8 = vcmask 195584   ;;  %s838_s18 = sshll.u32 %s1257_s1, 3 }
  0x52   : > { %v344_v8 = vmul.f32 %v1275_v2, %v291_v5  ;;  %v345_v9 = vmul.f32 %v1277_v3, %v292_v6  ;;  %v298_v11 = vld [vmem:[%s1267_s10 + $0x38] sm:$0xff]  ;;  %v293_v12 = vld [vmem:[%s1267_s10 + $0x10] sm:$0xff]  ;;  %v350_v13 = vmul.f32 %v1275_v2, %v297_v10  ;;  %v307_v22 = vld [vmem:[%s1267_s10 + $0x80] sm:$0xff]  ;;  %s248_s24 = scalar_lea.vmem [#allocation8], %s838_s18  ;;  %s841_s5 = sshll.u32 %s1090_s15, 7 }
  0x53   : > { %v351_v14 = vmul.f32 %v1277_v3, %v298_v11  ;;  %v294_v15 = vld [vmem:[%s1267_s10 + $0x18] sm:$0xff]  ;;  %v346_v16 = vmul.f32 %v1275_v2, %v293_v12  ;;  %v309_v17 = vld [vmem:[%s1267_s10 + $0x90] sm:$0xff]  ;;  %v398_v19 = vadd.f32 %v349_v7, %v348_v4  ;;  %v308_v23 = vld [vmem:[%s1267_s10 + $0x88] sm:$0xff]  ;;  %v360_v28 = vmul.f32 %v1275_v2, %v307_v22  ;;  %s280_s28 = scalar_lea.vmem [#allocation9], %s838_s18  ;;  %s696_s9 = scalar_lea.hbm %s1474_s3, %s841_s5 }
  0x54   : > { %v310_v18 = vld [vmem:[%s1267_s10 + $0x98] sm:$0xff]  ;;  %v392_v20 = vadd.f32 %v345_v9, %v344_v8  ;;  %v347_v21 = vmul.f32 %v1277_v3, %v294_v15  ;;  %v362_v25 = vmul.f32 %v1275_v2, %v309_v17  ;;  %v361_v29 = vmul.f32 %v1277_v3, %v308_v23  ;;  %v311_v30 = vld [vmem:[%s1267_s10 + $0xa0] sm:$0xff]  ;;  %v312_v31 = vld [vmem:[%s1267_s10 + $0xa8] sm:$0xff]  ;;  %s698_s29 = sshll.u32 %s280_s28, 4  ;;  %s685_s19 = scalar_lea.sflag [#allocation5], %s1257_s1  ;;  %s699_s29 = int_to_ptr.vmem [resolvable:$true] %s698_s29 }
  0x55   : > { %v401_v24 = vadd.f32 %v351_v14, %v350_v13  ;;  %v363_v26 = vmul.f32 %v1277_v3, %v310_v18  ;;  %399 = vadd.xlane.f32.xlu1 %v398_v19  ;;  %v299_v32 = vld [vmem:[%s1267_s10 + $0x40] sm:$0xff]  ;;  %v300_v33 = vld [vmem:[%s1267_s10 + $0x48] sm:$0xff]  ;;  %v364_v35 = vmul.f32 %v1275_v2, %v311_v30  ;;  %v365_v36 = vmul.f32 %v1277_v3, %v312_v31  ;;  %v313_v40 = vld [vmem:[%s1267_s10 + $0xb0] sm:$0xff]  ;;  %s1014_s21 = scalar_lea.vmem %s699_s29, 128  ;;  %s1107_s14 = smov [#allocation9]  }
  0x56   : > { %393 = vadd.xlane.f32.xlu0 %v392_v20  ;;  %v395_v27 = vadd.f32 %v347_v21, %v346_v16  ;;  %v416_v37 = vadd.f32 %v361_v29, %v360_v28  ;;  %v352_v38 = vmul.f32 %v1275_v2, %v299_v32  ;;  %v353_v39 = vmul.f32 %v1277_v3, %v300_v33  ;;  %v314_v41 = vld [vmem:[%s1267_s10 + $0xb8] sm:$0xff]  ;;  %v301_v42 = vld [vmem:[%s1267_s10 + $0x50] sm:$0xff]  ;;  %v323_v52 = vld [vmem:[%s1267_s10 + $0x100] sm:$0xff]  ;;  %p1015_p8 = scmp.ne.s32.totalorder %s699_s29, %s1014_s21  ;;  %s1018_s23 = sshll.u32 %s1107_s14, 4  ;;  %s1019_s23 = int_to_ptr.vmem [resolvable:$false] %s1018_s23 }
  0x57   : > { %v419_v34 = vadd.f32 %v363_v26, %v362_v25  ;;  %v302_v43 = vld [vmem:[%s1267_s10 + $0x58] sm:$0xff]  ;;  %v422_v44 = vadd.f32 %v365_v36, %v364_v35  ;;  %v366_v45 = vmul.f32 %v1275_v2, %v313_v40  ;;  %v367_v46 = vmul.f32 %v1277_v3, %v314_v41  ;;  %v325_v50 = vld [vmem:[%s1267_s10 + $0x110] sm:$0xff]  ;;  %v324_v53 = vld [vmem:[%s1267_s10 + $0x108] sm:$0xff]  ;;  %s1020_s15 = scalar_lea.vmem %s1019_s23, 256  ;;  %p1021_p4 = scmp.lt.s32.totalorder %s699_s29, %s1019_s23 }
  0x58   : > { %v404_v47 = vadd.f32 %v353_v39, %v352_v38  ;;  %v354_v48 = vmul.f32 %v1275_v2, %v301_v42  ;;  %v355_v49 = vmul.f32 %v1277_v3, %v302_v43  ;;  %v326_v51 = vld [vmem:[%s1267_s10 + $0x118] sm:$0xff]  ;;  %v378_v55 = vmul.f32 %v1275_v2, %v325_v50  ;;  %v315_v60 = vld [vmem:[%s1267_s10 + $0xc0] sm:$0xff]  ;;  %v316_v61 = vld [vmem:[%s1267_s10 + $0xc8] sm:$0xff]  ;;  %p1016_p0 = pnand %p1015_p8, %p1183_p9  ;;  %p1022_p5 = scmp.lt.s32.totalorder %s1020_s15, %s1014_s21 }
  0x59   : > { %402 = vadd.xlane.f32.xlu1 %v401_v24  ;;  %v425_v54 = vadd.f32 %v367_v46, %v366_v45  ;;  %v379_v56 = vmul.f32 %v1277_v3, %v326_v51  ;;  %v376_v58 = vmul.f32 %v1275_v2, %v323_v52  ;;  %v377_v59 = vmul.f32 %v1277_v3, %v324_v53  ;;  %v303_v62 = vld [vmem:[%s1267_s10 + $0x60] sm:$0xff]  ;;  %v304_v63 = vld [vmem:[%s1267_s10 + $0x68] sm:$0xff]  ;;  %v305_v8 = vld [vmem:[%s1267_s10 + $0x70] sm:$0xff] }
  0x5a   : > { %396 = vadd.xlane.f32.xlu0 %v395_v27  ;;  %v407_v57 = vadd.f32 %v355_v49, %v354_v48  ;;  %v368_v1 = vmul.f32 %v1275_v2, %v315_v60  ;;  %v369_v4 = vmul.f32 %v1277_v3, %v316_v61  ;;  %v356_v6 = vmul.f32 %v1275_v2, %v303_v62  ;;  %v306_v9 = vld [vmem:[%s1267_s10 + $0x78] sm:$0xff]  ;;  %v327_v10 = vld [vmem:[%s1267_s10 + $0x120] sm:$0xff]  ;;  %v328_v11 = vld [vmem:[%s1267_s10 + $0x128] sm:$0xff]  ;;  %p1017_p2 = pneg %p1016_p0  ;;  %p1023_p6 = por %p1022_p5, %p1021_p4 }
  0x5b   : > { %v443_v0 = vadd.f32 %v379_v56, %v378_v55  ;;  %v440_v5 = vadd.f32 %v377_v59, %v376_v58  ;;  %v357_v7 = vmul.f32 %v1277_v3, %v304_v63  ;;  %v358_v13 = vmul.f32 %v1275_v2, %v305_v8  ;;  %v329_v18 = vld [vmem:[%s1267_s10 + $0x130] sm:$0xff]  ;;  %v330_v19 = vld [vmem:[%s1267_s10 + $0x138] sm:$0xff]  ;;  %v331_v28 = vld [vmem:[%s1267_s10 + $0x140] sm:$0xff] }
  0x5c   : > { %v428_v12 = vadd.f32 %v369_v4, %v368_v1  ;;  %v359_v14 = vmul.f32 %v1277_v3, %v306_v9  ;;  %v380_v16 = vmul.f32 %v1275_v2, %v327_v10  ;;  %v381_v17 = vmul.f32 %v1277_v3, %v328_v11  ;;  %v317_v20 = vld [vmem:[%s1267_s10 + $0xd0] sm:$0xff]  ;;  %v318_v21 = vld [vmem:[%s1267_s10 + $0xd8] sm:$0xff]  ;;  %v332_v29 = vld [vmem:[%s1267_s10 + $0x148] sm:$0xff]  ;;  %p1024_p1 = pnand %p1023_p6, %p1017_p2 }
  0x5d   : > { %420 = vadd.xlane.f32.xlu1 %v419_v34  ;;  %v410_v15 = vadd.f32 %v357_v7, %v356_v6  ;;  %v382_v23 = vmul.f32 %v1275_v2, %v329_v18  ;;  %v383_v24 = vmul.f32 %v1277_v3, %v330_v19  ;;  %v370_v26 = vmul.f32 %v1275_v2, %v317_v20  ;;  %v319_v30 = vld [vmem:[%s1267_s10 + $0xe0] sm:$0xff]  ;;  %v320_v31 = vld [vmem:[%s1267_s10 + $0xe8] sm:$0xff]  ;;  %v333_v38 = vld [vmem:[%s1267_s10 + $0x150] sm:$0xff] }
  0x5e   : > { %417 = vadd.xlane.f32.xlu0 %v416_v37  ;;  %v413_v22 = vadd.f32 %v359_v14, %v358_v13  ;;  %v446_v25 = vadd.f32 %v381_v17, %v380_v16  ;;  %v371_v27 = vmul.f32 %v1277_v3, %v318_v21  ;;  %v384_v33 = vmul.f32 %v1275_v2, %v331_v28  ;;  %v334_v39 = vld [vmem:[%s1267_s10 + $0x158] sm:$0xff]  ;;  %v321_v40 = vld [vmem:[%s1267_s10 + $0xf0] sm:$0xff]  ;;  %v335_v48 = vld [vmem:[%s1267_s10 + $0x160] sm:$0xff] }
  0x5f   : > { %v449_v32 = vadd.f32 %v383_v24, %v382_v23  ;;  %v385_v34 = vmul.f32 %v1277_v3, %v332_v29  ;;  %v372_v36 = vmul.f32 %v1275_v2, %v319_v30  ;;  %v373_v37 = vmul.f32 %v1277_v3, %v320_v31  ;;  %v322_v41 = vld [vmem:[%s1267_s10 + $0xf8] sm:$0xff]  ;;  %v336_v49 = vld [vmem:[%s1267_s10 + $0x168] sm:$0xff]  ;;  %v337_v50 = vld [vmem:[%s1267_s10 + $0x170] sm:$0xff] }
  0x60   : > { %v431_v35 = vadd.f32 %v371_v27, %v370_v26  ;;  %v386_v43 = vmul.f32 %v1275_v2, %v333_v38  ;;  %v374_v45 = vmul.f32 %v1275_v2, %v321_v40  ;;  %v338_v51 = vld [vmem:[%s1267_s10 + $0x178] sm:$0xff]  ;;  %v1106_v52 = vmov 0.0  }
  0x61   : > { %423 = vadd.xlane.f32.xlu1 %v422_v44  ;;  %v452_v42 = vadd.f32 %v385_v34, %v384_v33  ;;  %v387_v44 = vmul.f32 %v1277_v3, %v334_v39  ;;  %v434_v46 = vadd.f32 %v373_v37, %v372_v36  ;;  %288 = vst.msk [vmem:[#allocation2] sm:$0xff] %vm287_vm0, %v1106_v52  ;;  %289 = vst.msk [vmem:[#allocation2 + $0x8] sm:$0xff] %vm287_vm0, %v1106_v52  ;;  %v488_v1 = vlaneseq }
  0x62   : > { %405 = vadd.xlane.f32.xlu0 %v404_v47  ;;  %v375_v47 = vmul.f32 %v1277_v3, %v322_v41  ;;  %290 = vst.msk [vmem:[#allocation2 + $0x10] sm:$0xff] %vm287_vm0, %v1106_v52  ;;  %v389_v55 = vmul.f32 %v1277_v3, %v336_v49  ;;  %v391_v58 = vmul.f32 %v1277_v3, %v338_v51 }
  0x63   : > { %v455_v53 = vadd.f32 %v387_v44, %v386_v43  ;;  %v489_v6 = vand.u32 127, %v488_v1  ;;  %v491_v7 = vshrl.u32 %v488_v1, 7 }
  0x64   : > { %v437_v56 = vadd.f32 %v375_v47, %v374_v45 }
  0x65   : > { %426 = vadd.xlane.f32.xlu1 %v425_v54  ;;  %v388_v54 = vmul.f32 %v1275_v2, %v335_v48 }
  0x66   : > { %408 = vadd.xlane.f32.xlu0 %v407_v57  ;;  %v390_v57 = vmul.f32 %v1275_v2, %v337_v50  ;;  %v1376_v2 = vsub.s32 %v489_v6, %v491_v7 }
  0x67   : > { %v458_v59 = vadd.f32 %v389_v55, %v388_v54 }
  0x68   : > { %v461_v60 = vadd.f32 %v391_v58, %v390_v57  ;;  %v341_v29 = vld [vmem:[#allocation2] sm:$0xff]  ;;  %v342_v57 = vld [vmem:[#allocation2 + $0x8] sm:$0xff] }
  0x69   : > { %444 = vadd.xlane.f32.xlu1 %v443_v0 }
  0x6a   : > { %441 = vadd.xlane.f32.xlu0 %v440_v5 }
  0x6d   : > { %429 = vadd.xlane.f32.xlu1 %v428_v12 }
  0x6e   : > { %411 = vadd.xlane.f32.xlu0 %v410_v15 }
  0x71   : > { %414 = vadd.xlane.f32.xlu1 %v413_v22 }
  0x72   : > { %447 = vadd.xlane.f32.xlu0 %v446_v25 }
  0x75   : > { %450 = vadd.xlane.f32.xlu1 %v449_v32 }
  0x76   : > { %432 = vadd.xlane.f32.xlu0 %v431_v35 }
  0x79   : > { %453 = vadd.xlane.f32.xlu1 %v452_v42 }
  0x7a   : > { %435 = vadd.xlane.f32.xlu0 %v434_v46 }
  0x7d   : > { %456 = vadd.xlane.f32.xlu1 %v455_v53 }
  0x7e   : > { %438 = vadd.xlane.f32.xlu0 %v437_v56 }
  0x81   : > { %462 = vadd.xlane.f32.xlu1 %v461_v60 }
  0x82   : > { %459 = vadd.xlane.f32.xlu0 %v458_v59 }
  0xde   : > { %v400_v61 = vpop.xlane.xlu1 %399 }
  0xdf   : > { %v394_v62 = vpop.xlane.xlu0 %393  ;;  %v501_v16 = vrot.slane %v400_v61, %v1376_v2 }
  0xe0   : > { %v493_v12 = vrot.slane %v394_v62, %v1376_v2 }
  0xe2   : > { %v403_v63 = vpop.xlane.xlu1 %402 }
  0xe3   : > { %v397_v0 = vpop.xlane.xlu0 %396  ;;  %v505_v17 = vrot.slane %v403_v63, %v1376_v2 }
  0xe4   : > { %v497_v11 = vrot.slane %v397_v0, %v1376_v2 }
  0xe6   : > { %v421_v4 = vpop.xlane.xlu1 %420  ;;  %v587_v15 = vsel %vm586_vm1, %v497_v11, %v493_v12 }
  0xe7   : > { %v418_v5 = vpop.xlane.xlu0 %417  ;;  %v589_v18 = vsel %vm588_vm2, %v501_v16, %v587_v15  ;;  %v529_v36 = vrot.slane %v421_v4, %v1376_v2 }
  0xe8   : > { %v591_v24 = vsel %vm590_vm3, %v505_v17, %v589_v18  ;;  %v525_v37 = vrot.slane %v418_v5, %v1376_v2 }
  0xea   : > { %v424_v8 = vpop.xlane.xlu1 %423  ;;  %v600_v43 = vsel %vm586_vm1, %v529_v36, %v525_v37 }
  0xeb   : > { %v406_v9 = vpop.xlane.xlu0 %405  ;;  %v533_v38 = vrot.slane %v424_v8, %v1376_v2 }
  0xec   : > { %v509_v19 = vrot.slane %v406_v9, %v1376_v2 }
  0xed   : > { %v601_v45 = vsel %vm588_vm2, %v533_v38, %v600_v43 }
  0xee   : > { %v427_v3 = vpop.xlane.xlu1 %426  ;;  %v593_v25 = vsel %vm592_vm4, %v509_v19, %v591_v24 }
  0xef   : > { %v409_v10 = vpop.xlane.xlu0 %408  ;;  %v537_v39 = vrot.slane %v427_v3, %v1376_v2 }
  0xf0   : > { %v513_v22 = vrot.slane %v409_v10, %v1376_v2  ;;  %v343_v10 = vld [vmem:[#allocation2 + $0x10] sm:$0xff] }
  0xf1   : > { %v602_v49 = vsel %vm590_vm3, %v537_v39, %v601_v45 }
  0xf2   : > { %v445_v13 = vpop.xlane.xlu1 %444  ;;  %v595_v28 = vsel %vm594_vm5, %v513_v22, %v593_v25 }
  0xf3   : > { %v442_v14 = vpop.xlane.xlu0 %441  ;;  %v561_v46 = vrot.slane %v445_v13, %v1376_v2 }
  0xf4   : > { %v557_v47 = vrot.slane %v442_v14, %v1376_v2 }
  0xf6   : > { %v430_v20 = vpop.xlane.xlu1 %429  ;;  %v607_v60 = vsel %vm586_vm1, %v561_v46, %v557_v47 }
  0xf7   : > { %v412_v21 = vpop.xlane.xlu0 %411  ;;  %v541_v40 = vrot.slane %v430_v20, %v1376_v2 }
  0xf8   : > { %v517_v23 = vrot.slane %v412_v21, %v1376_v2 }
  0xf9   : > { %v603_v51 = vsel %vm592_vm4, %v541_v40, %v602_v49 }
  0xfa   : > { %v415_v26 = vpop.xlane.xlu1 %414  ;;  %v597_v31 = vsel %vm596_vm6, %v517_v23, %v595_v28  ;;  %v674_v23 = vld [vmem:[%s248_s24] sm:$0xff] }
  0xfb   : > { %v448_v27 = vpop.xlane.xlu0 %447  ;;  %v521_v30 = vrot.slane %v415_v26, %v1376_v2  ;;  %v675_v24 = vsub.f32 1.0, %v674_v23 }
  0xfc   : > { %v565_v50 = vrot.slane %v448_v27, %v1376_v2 }
  0xfd   : > { %v599_v32 = vsel %vm598_vm7, %v521_v30, %v597_v31 }
  0xfe   : > { %v617_v33 = vadd.f32 %v599_v32, %v341_v29  ;;  %v451_v34 = vpop.xlane.xlu1 %450  ;;  %v608_v63 = vsel %vm588_vm2, %v565_v50, %v607_v60 }
  0xff   : > { %v433_v35 = vpop.xlane.xlu0 %432  ;;  %v569_v52 = vrot.slane %v451_v34, %v1376_v2 }
 0x100   : > { %621 = vst.msk [vmem:[#allocation2] sm:$0xff] %vm287_vm0, %v617_v33  ;;  %v545_v44 = vrot.slane %v433_v35, %v1376_v2 }
 0x101   : > { %v609_v1 = vsel %vm590_vm3, %v569_v52, %v608_v63 }
 0x102   : > { %v454_v41 = vpop.xlane.xlu1 %453  ;;  %v604_v55 = vsel %vm594_vm5, %v545_v44, %v603_v51 }
 0x103   : > { %v436_v42 = vpop.xlane.xlu0 %435  ;;  %v573_v56 = vrot.slane %v454_v41, %v1376_v2 }
 0x104   : > { %v549_v48 = vrot.slane %v436_v42, %v1376_v2 }
 0x105   : > { %v610_v7 = vsel %vm592_vm4, %v573_v56, %v609_v1 }
 0x106   : > { %v457_v53 = vpop.xlane.xlu1 %456  ;;  %v605_v61 = vsel %vm596_vm6, %v549_v48, %v604_v55 }
 0x107   : > { %v439_v54 = vpop.xlane.xlu0 %438  ;;  %v627_v59 = vld [vmem:[#allocation2] sm:$0xff]  ;;  %v577_v62 = vrot.slane %v457_v53, %v1376_v2 }
 0x108   : > { %v553_v58 = vrot.slane %v439_v54, %v1376_v2  ;;  %630 = vxpose.xlu0.b32.start [1/3] (short) (narrow) %v627_v59, 8 }
 0x109   : > { %v611_v3 = vsel %vm594_vm5, %v577_v62, %v610_v7 }
 0x10a   : > { %v606_v0 = vsel %vm598_vm7, %v553_v58, %v605_v61  ;;  %v463_v6 = vpop.xlane.xlu1 %462 }
 0x10b   : > { %v618_v4 = vadd.f32 %v606_v0, %v342_v57  ;;  %v460_v5 = vpop.xlane.xlu0 %459  ;;  %v585_v9 = vrot.slane %v463_v6, %v1376_v2 }
 0x10c   : > { %v581_v8 = vrot.slane %v460_v5, %v1376_v2 }
 0x10d   : > { %622 = vst.msk [vmem:[#allocation2 + $0x8] sm:$0xff] %vm287_vm0, %v618_v4 }
 0x10e   : > { %v612_v11 = vsel %vm596_vm6, %v581_v8, %v611_v3 }
 0x10f   : > { %v613_v12 = vsel %vm598_vm7, %v585_v9, %v612_v11 }
 0x110   : > { %v619_v13 = vadd.f32 %v613_v12, %v343_v10 }
 0x112   : > { %623 = vst.msk [vmem:[#allocation2 + $0x10] sm:$0xff] %vm287_vm0, %v619_v13 }
 0x114   : > { %v628_v14 = vld [vmem:[#allocation2 + $0x8] sm:$0xff] }
 0x115   : > { %631 = vxpose.xlu0.b32.cont [2/3] (short) (narrow) %v628_v14, 8 }
 0x119   : > { %v629_v15 = vld [vmem:[#allocation2 + $0x10] sm:$0xff] }
 0x11a   : > { %632 = vxpose.xlu0.b32.end [3/3] (short) (narrow) %v629_v15, 8 }
 0x18e   : > { %v646_v16 = vpop.trf.xlu0 }
 0x18f   : > { %v663_v2 = vsel %vm662_vm8, %v646_v16, -inf }
 0x190   : > { %664 = vmax.xlane.f32.xlu1 %v663_v2 }
 0x219   : > { %v665_v17 = vpop.xlane.xlu1 %664 }
 0x21a   : > { %v666_v18 = vsub.f32 %v646_v16, %v665_v17 }
 0x21c   : > { %v667_v19 = vmul.f32 1.442695, %v666_v18 }
 0x21e   : > { %924 = vpow2.f32 %v667_v19 }
 0x22b   : > { %v925_v20 = vpop.eup %924 }
 0x22c   : > { %v669_v21 = vsel %vm662_vm8, %v925_v20, 0.0 }
 0x22d   : > { %670 = vadd.xlane.f32.xlu1 %v669_v21 }
 0x2b6   : > { %v671_v22 = vpop.xlane.xlu1 %670 }
 0x2b7   : > { %926 = vrcp.f32 %v671_v22 }
 0x2c4   : > { %v927_v25 = vpop.eup %926 }
 0x2c5   : > { %v673_v26 = vmul.f32 %v927_v25, %v925_v20 }
 0x2c7   : > { %v676_v27 = vmul.f32 %v675_v24, %v673_v26 }
 0x2c9   : > { %v677_v28 = vsel %vm662_vm8, %v676_v27, 0.0 }
 0x2ca   : > { %678 = vadd.xlane.f32.xlu1 %v677_v28 }
 0x353   : > { %v679_v29 = vpop.xlane.xlu1 %678 }
 0x354   : > { %v680_v30 = vadd.f32 1e-10, %v679_v29 }
 0x356   : > { %928 = vrcp.f32 %v680_v30 }
 0x363   : > { %v929_v31 = vpop.eup %928 }
 0x364   : > { %v682_v32 = vmul.f32 %v929_v31, %v676_v27 }
 0x366   : > { %683 = vst.msk [vmem:[%s280_s28] sm:$0xff] %vm662_vm8, %v682_v32 }
 0x367   : > { %1027 = shalt.err (!%p1024_p1)
}
 0x368   : > { %s1028_s8 = scalar_lea.hbm %s696_s9, 128  ;;  %s1032_s26 = scalar_lea.hbm %s1474_s3, 256 }
 0x369   : > { %p1029_p7 = scmp.ne.s32.totalorder %s696_s9, %s1028_s8  ;;  %p1033_p3 = scmp.lt.s32.totalorder %s696_s9, %s1474_s3 }
 0x36a   : > { %p1034_p8 = scmp.lt.s32.totalorder %s1032_s26, %s1028_s8 }
 0x36b   : > { %p1030_p10 = pnand %p1029_p7, %p1183_p9 }
 0x36c   : > { %p1035_p0 = por %p1034_p8, %p1033_p3 }
 0x36d   : > { %p1031_p13 = pneg %p1030_p10 }
 0x36f   : > { %p1036_p12 = pnand %p1035_p0, %p1031_p13 }
 0x371   : > { %1039 = shalt.err (!%p1036_p12)
}
 0x372   : > { %854 = dma.vmem_to_hbm [thread:$0]  (%p1183_p9), %s699_s29, 128, %s696_s9, %s685_s19  }
 0x373 PF: > { %s710_s11 = sand.u32 1, %s1078_s12   ;;  %p1488_p2 = scmp.ge.s32.totalorder %s1098_s17, 2 }
 0x374   : > { %s711_s7 = scalar_lea.sflag [#allocation5], %s710_s11 }
 0x375   : > { %p867_p4 = pnand %p1488_p2, %p1190_p11 }
 0x377   : > { %p868_p5 = pneg %p867_p4 }
 0x379   : > { %1073 = dma.done.wait (%p868_p5), %s711_s7, 128  }
 0x37a   : > { %1075 = vsyncadd (%p868_p5), %s711_s7, 4294967168  ;;  %s22_s17 = sadd.s32 1, %s1098_s17   ;;  %s1489_s10 = sld [smem:[#allocation13_spill]] }
 0x37b   : > { %p19_p6 = scmp.ge.s32.totalorder %s22_s17, 4   ;;  %s1490_s14 = sld [smem:[#allocation15_spill]] }
 0x37c   : > { %s1491_s25 = sld [smem:[#allocation14_spill]]  ;;  %s1492_s12 = smov %s1082_s13 }
 0x37d   : > { %s1494_s15 = smov %s1094_s16 }
 0x37e   :  { %21 = sbr.rel (!%p19_p6) target bundleno = 10 (0xa), region = 109 }
 0x380   : > { %s1493_s13 = smov %s1489_s10 }
 0x382   : > { %s1495_s16 = smov %s1491_s25 }
 0x383   :  { %716 = vsyncpa [#allocation4], 1 }
 0x384   :  { %718 = vsyncpa [#allocation4 + $0x1], 1 }
 0x385   :  { %719 = vsyncpa [#allocation7], 1 }
 0x386   :  { %721 = vsyncpa [#allocation7 + $0x1], 1 }
 0x387   :  { %722 = vsyncpa [#allocation5], 1 }
 0x388   :  { %724 = vsyncpa [#allocation5 + $0x1], 1 }

</bundles_post_ra>
